<compile_context>
chip_gen: v7x
topology: tpu7x:2x2x1
jax: 0.10.0
libtpu: 0.0.40
codegen_flags: <defaults>
</compile_context>

<pallas_src>
import jax
import jax.numpy as jnp
import numpy as np
from jax.experimental import pallas as pl
from jax.experimental.pallas import tpu as pltpu


def mlp_kernel(w1_ref, b1_ref, w2_ref, b2_ref, xt_ref, ot_ref):
    """Linear -> Sigmoid -> Linear with the batch on the lane (last) axis.

    xt_ref : VMEM [in_size, TB]   (x transposed; batch on lanes -> lane-dense)
    w*/b*  : SMEM scalars (tiny weights; contraction on the VPU, MXU unused)
    ot_ref : VMEM [out_size, TB]  (lane-dense output, unmasked stores)
    """
    hid, in_size = w1_ref.shape
    out_size = w2_ref.shape[0]

    xt = xt_ref[...]                                     # [in, TB] f32
    x_rows = [xt[k:k + 1, :] for k in range(in_size)]    # [1, TB] each

    # Hidden layer: hT[j] = sigmoid(sum_k w1[j,k] * xT[k] + b1[j])
    # (scalar-operand VPU FMAs + EUP sigmoid; loops unroll at trace time)
    h_rows = []
    for j in range(hid):
        acc = x_rows[0] * w1_ref[j, 0]
        for k in range(1, in_size):
            acc = acc + x_rows[k] * w1_ref[j, k]
        h_rows.append(jax.nn.sigmoid(acc + b1_ref[j]))

    # Output layer: oT[j] = sum_k w2[j,k] * sT[k] + b2[j]
    for j in range(out_size):
        acc = h_rows[0] * w2_ref[j, 0]
        for k in range(1, hid):
            acc = acc + h_rows[k] * w2_ref[j, k]
        ot_ref[j:j + 1, :] = (acc + b2_ref[j]).astype(ot_ref.dtype)


def _round_up(n, m):
    return ((n + m - 1) // m) * m


def mlp_forward(x, w1, b1, w2, b2, *, block_b=512):
    """x: [B, in], w1: [hid, in], b1: [hid], w2: [out, hid], b2: [out]."""
    B, in_size = x.shape
    hid = w1.shape[0]
    out_size = w2.shape[0]

    # Batch on the lane axis, padded to a multiple of the batch tile.
    tb = min(block_b, _round_up(B, 128))
    b_pad = _round_up(B, tb)
    xt = x.T                                             # [in, B]
    if b_pad != B:
        xt = jnp.pad(xt, ((0, 0), (0, b_pad - B)))

    grid = (b_pad // tb,)
    smem = pl.BlockSpec(memory_space=pltpu.MemorySpace.SMEM)

    cost = pl.CostEstimate(
        flops=2 * B * (in_size * hid + hid * out_size),
        transcendentals=B * hid,
        bytes_accessed=(xt.size + out_size * b_pad
                        + w1.size + b1.size + w2.size + b2.size) * 4,
    )

    ot = pl.pallas_call(
        mlp_kernel,
        out_shape=jax.ShapeDtypeStruct((out_size, b_pad), jnp.float32),
        grid=grid,
        in_specs=[smem, smem, smem, smem,
                  pl.BlockSpec((in_size, tb), lambda i: (0, i))],
        out_specs=pl.BlockSpec((out_size, tb), lambda i: (0, i)),
        compiler_params=pltpu.CompilerParams(
            dimension_semantics=("parallel",)),
        cost_estimate=cost,
    )(w1, b1, w2, b2, xt)

    return ot[:, :B].T                                   # [B, out]


if __name__ == "__main__":
    input_size, hidden_size, output_size = 2, 2, 1

    # Deterministic parameter init (mimics nn.Linear uniform(-1/sqrt(fan_in), +))
    key = jax.random.PRNGKey(0)
    k1, k2, k3, k4 = jax.random.split(key, 4)
    bound1 = 1.0 / np.sqrt(input_size)
    bound2 = 1.0 / np.sqrt(hidden_size)
    w1 = jax.random.uniform(k1, (hidden_size, input_size), jnp.float32, -bound1, bound1)
    b1 = jax.random.uniform(k2, (hidden_size,), jnp.float32, -bound1, bound1)
    w2 = jax.random.uniform(k3, (output_size, hidden_size), jnp.float32, -bound2, bound2)
    b2 = jax.random.uniform(k4, (output_size,), jnp.float32, -bound2, bound2)

    # NAND truth-table inputs from the original script.
    x = jnp.array([[1.0, 1.0], [1.0, 0.0], [0.0, 1.0], [0.0, 0.0]], dtype=jnp.float32)

    out = mlp_forward(x, w1, b1, w2, b2)
    out = jax.block_until_ready(out)

    # Reference check in plain JAX
    ref = jax.nn.sigmoid(x @ w1.T + b1) @ w2.T + b2
    assert out.shape == (4, 1)
    np.testing.assert_allclose(np.asarray(out), np.asarray(ref), rtol=1e-5, atol=1e-5)

    print("KERNEL_OK")
</pallas_src>

<mosaic_0001>
module attributes {stable_mosaic.version = 11 : i64} {
  func.func @mlp_kernel(%arg0: i32, %arg1: memref<2x2xf32, #tpu.memory_space<smem>>, %arg2: memref<2xf32, #tpu.memory_space<smem>>, %arg3: memref<1x2xf32, #tpu.memory_space<smem>>, %arg4: memref<1xf32, #tpu.memory_space<smem>>, %arg5: memref<2x128xf32, #tpu.memory_space<vmem>>, %arg6: memref<1x128xf32, #tpu.memory_space<vmem>>) attributes {dimension_semantics = [#tpu.dimension_semantics<parallel>], iteration_bounds = array<i64: 1>, scalar_prefetch = 0 : i64, scratch_operands = 0 : i64, tpu.core_type = #tpu.core_type<tc>, window_params = [{transform_indices = @transform_0, window_bounds = array<i64: 2, 2>}, {transform_indices = @transform_1, window_bounds = array<i64: 2>}, {transform_indices = @transform_2, window_bounds = array<i64: 1, 2>}, {transform_indices = @transform_3, window_bounds = array<i64: 1>}, {transform_indices = @transform_4, window_bounds = array<i64: 2, 128>}, {transform_indices = @transform_5, window_bounds = array<i64: 1, 128>}]} {
    %c0 = arith.constant 0 : index
    %c0_0 = arith.constant 0 : index
    %0 = vector.load %arg5[%c0, %c0_0] : memref<2x128xf32, #tpu.memory_space<vmem>>, vector<2x128xf32>
    %1 = vector.extract_strided_slice %0 {offsets = [0, 0], sizes = [1, 128], strides = [1, 1]} : vector<2x128xf32> to vector<1x128xf32>
    %2 = vector.extract_strided_slice %0 {offsets = [1, 0], sizes = [1, 128], strides = [1, 1]} : vector<2x128xf32> to vector<1x128xf32>
    %c0_1 = arith.constant 0 : index
    %c0_2 = arith.constant 0 : index
    %3 = memref.load %arg1[%c0_1, %c0_2] : memref<2x2xf32, #tpu.memory_space<smem>>
    %4 = vector.broadcast %3 : f32 to vector<1x128xf32>
    %5 = arith.mulf %1, %4 : vector<1x128xf32>
    %c0_3 = arith.constant 0 : index
    %c1 = arith.constant 1 : index
    %6 = memref.load %arg1[%c0_3, %c1] : memref<2x2xf32, #tpu.memory_space<smem>>
    %7 = vector.broadcast %6 : f32 to vector<1x128xf32>
    %8 = arith.mulf %2, %7 : vector<1x128xf32>
    %9 = arith.addf %5, %8 : vector<1x128xf32>
    %c0_4 = arith.constant 0 : index
    %10 = memref.load %arg2[%c0_4] : memref<2xf32, #tpu.memory_space<smem>>
    %11 = vector.broadcast %10 : f32 to vector<1x128xf32>
    %12 = arith.addf %9, %11 : vector<1x128xf32>
    %13 = arith.negf %12 : vector<1x128xf32>
    %14 = math.exp %13 : vector<1x128xf32>
    %cst = arith.constant 1.000000e+00 : f32
    %15 = vector.broadcast %cst : f32 to vector<1x128xf32>
    %16 = arith.addf %15, %14 : vector<1x128xf32>
    %17 = arith.divf %15, %16 : vector<1x128xf32>
    %c1_5 = arith.constant 1 : index
    %c0_6 = arith.constant 0 : index
    %18 = memref.load %arg1[%c1_5, %c0_6] : memref<2x2xf32, #tpu.memory_space<smem>>
    %19 = vector.broadcast %18 : f32 to vector<1x128xf32>
    %20 = arith.mulf %1, %19 : vector<1x128xf32>
    %c1_7 = arith.constant 1 : index
    %c1_8 = arith.constant 1 : index
    %21 = memref.load %arg1[%c1_7, %c1_8] : memref<2x2xf32, #tpu.memory_space<smem>>
    %22 = vector.broadcast %21 : f32 to vector<1x128xf32>
    %23 = arith.mulf %2, %22 : vector<1x128xf32>
    %24 = arith.addf %20, %23 : vector<1x128xf32>
    %c1_9 = arith.constant 1 : index
    %25 = memref.load %arg2[%c1_9] : memref<2xf32, #tpu.memory_space<smem>>
    %26 = vector.broadcast %25 : f32 to vector<1x128xf32>
    %27 = arith.addf %24, %26 : vector<1x128xf32>
    %28 = arith.negf %27 : vector<1x128xf32>
    %29 = math.exp %28 : vector<1x128xf32>
    %cst_10 = arith.constant 1.000000e+00 : f32
    %30 = vector.broadcast %cst_10 : f32 to vector<1x128xf32>
    %31 = arith.addf %30, %29 : vector<1x128xf32>
    %32 = arith.divf %30, %31 : vector<1x128xf32>
    %c0_11 = arith.constant 0 : index
    %c0_12 = arith.constant 0 : index
    %33 = memref.load %arg3[%c0_11, %c0_12] : memref<1x2xf32, #tpu.memory_space<smem>>
    %34 = vector.broadcast %33 : f32 to vector<1x128xf32>
    %35 = arith.mulf %17, %34 : vector<1x128xf32>
    %c0_13 = arith.constant 0 : index
    %c1_14 = arith.constant 1 : index
    %36 = memref.load %arg3[%c0_13, %c1_14] : memref<1x2xf32, #tpu.memory_space<smem>>
    %37 = vector.broadcast %36 : f32 to vector<1x128xf32>
    %38 = arith.mulf %32, %37 : vector<1x128xf32>
    %39 = arith.addf %35, %38 : vector<1x128xf32>
    %c0_15 = arith.constant 0 : index
    %40 = memref.load %arg4[%c0_15] : memref<1xf32, #tpu.memory_space<smem>>
    %41 = vector.broadcast %40 : f32 to vector<1x128xf32>
    %42 = arith.addf %39, %41 : vector<1x128xf32>
    %c0_16 = arith.constant 0 : index
    %c0_17 = arith.constant 0 : index
    %43 = vector.load %arg6[%c0_16, %c0_17] : memref<1x128xf32, #tpu.memory_space<vmem>>, vector<1x128xf32>
    tpu.vector_store %arg6[%c0_16, %c0_17], %42 {strides = array<i32>} : memref<1x128xf32, #tpu.memory_space<vmem>>, vector<1x128xf32>,
    return
  }
  func.func @transform_0(%arg0: i32) -> (i32, i32) {
    %c0_i32 = arith.constant 0 : i32
    %c0_i32_0 = arith.constant 0 : i32
    %c0_i32_1 = arith.constant 0 : i32
    return %c0_i32, %c0_i32_0 : i32, i32
  }
  func.func @transform_1(%arg0: i32) -> i32 {
    %c0_i32 = arith.constant 0 : i32
    %c0_i32_0 = arith.constant 0 : i32
    return %c0_i32 : i32
  }
  func.func @transform_2(%arg0: i32) -> (i32, i32) {
    %c0_i32 = arith.constant 0 : i32
    %c0_i32_0 = arith.constant 0 : i32
    %c0_i32_1 = arith.constant 0 : i32
    return %c0_i32, %c0_i32_0 : i32, i32
  }
  func.func @transform_3(%arg0: i32) -> i32 {
    %c0_i32 = arith.constant 0 : i32
    %c0_i32_0 = arith.constant 0 : i32
    return %c0_i32 : i32
  }
  func.func @transform_4(%arg0: i32) -> (i32, i32) {
    %c0_i32 = arith.constant 0 : i32
    %c0_i32_0 = arith.constant 0 : i32
    return %c0_i32, %arg0 : i32, i32
  }
  func.func @transform_5(%arg0: i32) -> (i32, i32) {
    %c0_i32 = arith.constant 0 : i32
    %c0_i32_0 = arith.constant 0 : i32
    return %c0_i32, %arg0 : i32, i32
  }
}

</mosaic_0001>

<bundles_post_ra>
// kernel: tpu_custom_call.1
= control target key start
LH: loop header
LB: loop body
LE: loop exit
PB: predicated region body
PF: predicated region fallthrough
CT: control target
= control target key end

     0   :  { %11 = vsyncpa [#allocation5], 0  ;;  %s268_s0 = inlined_call_operand.vmem [shape: f32[2,2], index: 0, kind: input, shape index: {}]   ;;  %s269_s1 = inlined_call_operand.vmem [shape: f32[2], index: 1, kind: input, shape index: {}]   ;;  %s270_s2 = inlined_call_operand.vmem [shape: f32[1,2], index: 2, kind: input, shape index: {}]   ;;  %s271_s3 = inlined_call_operand.<no memory space> [shape: f32[1], index: 3, kind: input, shape index: {}]   ;;  %s272_s4 = inlined_call_operand.vmem [shape: f32[2,128], index: 4, kind: input, shape index: {}]   ;;  %s273_s5 = inlined_call_operand.hbm [shape: f32[1,128], index: 5, kind: output, shape index: {}]  }
   0x1   :  { %12 = vsyncpa [#allocation7], 0  ;;  %s30_s20 = sshll.u32 %s269_s1, 4  ;;  %s31_s20 = int_to_ptr.vmem [resolvable:$true] %s30_s20 }
   0x2   :  { %13 = vsyncpa [#allocation4], 0  ;;  %s20_s23 = sshll.u32 %s268_s0, 4  ;;  %s143_s24 = scalar_lea.vmem %s31_s20, 16  ;;  %s21_s23 = int_to_ptr.vmem [resolvable:$true] %s20_s23 }
   0x3   :  { %p144_p0 = scmp.ne.s32.totalorder %s31_s20, %s143_s24  ;;  %p148_p1 = scmp.lt.s32.totalorder %s31_s20, %s31_s20 }
   0x4   :  { %p149_p2 = scmp.lt.s32.totalorder %s143_s24, %s143_s24 }
   0x6   :  { %p150_p3 = por %p149_p2, %p148_p1 }
   0x8   :  { %p151_p4 = pnand %p150_p3, %p144_p0 }
   0xa   :  { %154 = shalt.err (!%p151_p4)
}
   0xb   :  { %s207_s25 = smov [#allocation6]   ;;  %s155_s26 = scalar_lea.vmem %s21_s23, 32 }
   0xc   :  { %33 = dma.vmem_to_smem %s31_s20, 16, %s207_s25, [#allocation7]  }
   0xd   :  { %p156_p5 = scmp.ne.s32.totalorder %s21_s23, %s155_s26  ;;  %p160_p6 = scmp.lt.s32.totalorder %s21_s23, %s21_s23 }
   0xe   :  { %p161_p7 = scmp.lt.s32.totalorder %s155_s26, %s155_s26 }
  0x10   :  { %p162_p8 = por %p161_p7, %p160_p6 }
  0x12   :  { %p163_p9 = pnand %p162_p8, %p156_p5 }
  0x14   :  { %166 = shalt.err (!%p163_p9)
}
  0x15   :  { %s208_s1 = smov [#allocation3]   ;;  %s40_s28 = sshll.u32 %s270_s2, 4  ;;  %s41_s28 = int_to_ptr.vmem [resolvable:$true] %s40_s28 }
  0x16   :  { %23 = dma.vmem_to_smem %s21_s23, 32, %s208_s1, [#allocation5]  }
  0x17   :  { %s167_s29 = scalar_lea.vmem %s41_s28, 16  ;;  %p172_p11 = scmp.lt.s32.totalorder %s41_s28, %s41_s28 }
  0x18   :  { %p168_p10 = scmp.ne.s32.totalorder %s41_s28, %s167_s29  ;;  %p173_p12 = scmp.lt.s32.totalorder %s167_s29, %s167_s29 }
  0x1a   :  { %p174_p13 = por %p173_p12, %p172_p11 }
  0x1c   :  { %p175_p0 = pnand %p174_p13, %p168_p10 }
  0x1e   :  { %178 = shalt.err (!%p175_p0)
}
  0x1f   :  { %s209_s30 = smov [#allocation8]  }
  0x20   :  { %43 = dma.vmem_to_smem %s41_s28, 16, %s209_s30, [#allocation7]  }
  0x21   :  { %201 = dma.done.wait [#allocation5], 32  }
  0x22   :  { %202 = vsyncadd [#allocation5], 4294967264 }
  0x23   :  { %203 = dma.done.wait [#allocation7], 32  }
  0x24   :  { %204 = vsyncadd [#allocation7], 4294967264 }
  0x25   :  { %57 = sfence }
  0x26   :  { %s59_s6 = sld [smem:[#allocation3]]  ;;  %s124_s7 = sld [smem:[#allocation3 + $0x1]]  ;;  %v58_v0 = vld [vmem:[%s272_s4] sm:$0x3]  ;;  %v105_v29 = vstv %s271_s3 }
  0x27   :  { %s126_s8 = sld [smem:[#allocation3 + $0x80]]  ;;  %s127_s2 = sld [smem:[#allocation3 + $0x81]] }
  0x28   :  { %s69_s9 = sld [smem:[#allocation6]]  ;;  %s128_s12 = sld [smem:[#allocation6 + $0x1]] }
  0x29   :  { %s97_s4 = sld [smem:[#allocation8]]  ;;  %s130_s13 = sld [smem:[#allocation8 + $0x1]] }
  0x2a   :  { %s210_s16 = smov [#allocation9]  }
  0x2b   :  { %s114_s17 = sshll.u32 %s210_s16, 4  ;;  %s115_s17 = int_to_ptr.vmem [resolvable:$true] %s114_s17 }
  0x2c   :  { %v60_v1 = vstv %s59_s6  ;;  %v63_v2 = vstv %s124_s7  ;;  %s179_s18 = scalar_lea.vmem %s115_s17, 16  ;;  %s183_s19 = scalar_lea.vmem %s115_s17, 32 }
  0x2d   :  { %v61_v3 = vmul.f32 %v60_v1, %v58_v0  ;;  %v64_v4 = vmul.f32 %v63_v2, %v58_v0  ;;  %v79_v5 = vstv %s126_s8  ;;  %v82_v6 = vstv %s127_s2  ;;  %p180_p1 = scmp.ne.s32.totalorder %s115_s17, %s179_s18  ;;  %p184_p2 = scmp.lt.s32.totalorder %s115_s17, %s115_s17 }
  0x2e   :  { %v80_v8 = vmul.f32 %v79_v5, %v58_v0  ;;  %v83_v9 = vmul.f32 %v82_v6, %v58_v0  ;;  %v70_v10 = vstv %s69_s9  ;;  %v89_v13 = vstv %s128_s12  ;;  %p185_p3 = scmp.lt.s32.totalorder %s183_s19, %s179_s18 }
  0x2f   :  { %v66_v7 = vrot.slane %v64_v4, 1  ;;  %v98_v23 = vstv %s97_s4  ;;  %v101_v25 = vstv %s130_s13 }
  0x30   :  { %v85_v12 = vrot.slane %v83_v9, 1  ;;  %p186_p4 = por %p185_p3, %p184_p2 }
  0x31   :  { %v68_v11 = vadd.f32 %v66_v7, %v61_v3 }
  0x32   :  { %v87_v15 = vadd.f32 %v85_v12, %v80_v8  ;;  %p187_p5 = pnand %p186_p4, %p180_p1 }
  0x33   :  { %v71_v14 = vadd.f32 %v70_v10, %v68_v11 }
  0x34   :  { %v90_v17 = vadd.f32 %v89_v13, %v87_v15 }
  0x35   :  { %v125_v16 = vmul.f32 -1.442695, %v71_v14 }
  0x36   :  { %v129_v18 = vmul.f32 -1.442695, %v90_v17 }
  0x37   :  { %135 = vpow2.f32 %v125_v16 }
  0x38   :  { %137 = vpow2.f32 %v129_v18 }
  0x41   :  { %v136_v19 = vpop.eup %135 }
  0x42   :  { %v75_v20 = vadd.f32 1.0, %v136_v19  ;;  %v138_v21 = vpop.eup %137 }
  0x43   :  { %v94_v22 = vadd.f32 1.0, %v138_v21 }
  0x44   :  { %139 = vrcp.f32 %v75_v20 }
  0x45   :  { %141 = vrcp.f32 %v94_v22 }
  0x4e   :  { %v140_v24 = vpop.eup %139 }
  0x4f   :  { %v99_v26 = vmul.f32 %v140_v24, %v98_v23  ;;  %v142_v27 = vpop.eup %141 }
  0x50   :  { %v102_v28 = vmul.f32 %v142_v27, %v101_v25 }
  0x52   :  { %v103_v30 = vadd.f32 %v102_v28, %v99_v26 }
  0x54   :  { %v106_v31 = vadd.f32 %v105_v29, %v103_v30 }
  0x56   :  { %107 = vst [vmem:[#allocation9] sm:$0x1] %v106_v31 }
  0x57   :  { %190 = shalt.err (!%p187_p5)
}
  0x58   :  { %s191_s22 = scalar_lea.hbm %s273_s5, 16 }
  0x59   :  { %p192_p6 = scmp.ne.s32.totalorder %s273_s5, %s191_s22  ;;  %p195_p7 = scmp.lt.u32.totalorder %s191_s22, %s273_s5 }
  0x5b   :  { %p197_p8 = pnand %p195_p7, %p192_p6 }
  0x5d   :  { %200 = shalt.err (!%p197_p8)
}
  0x5e   :  { %117 = dma.vmem_to_hbm [thread:$0]  %s115_s17, 16, %s273_s5, [#allocation4]  }
  0x5f   :  { %205 = dma.done.wait [#allocation4], 16  }
  0x60   :  { %206 = vsyncadd [#allocation4], 4294967280 }
  0x61   :  { %121 = vsyncpa [#allocation4], 1 }
  0x62   :  { %122 = vsyncpa [#allocation5], 1 }
  0x63   :  { %123 = vsyncpa [#allocation7], 1 }

</bundles_post_ra>
